<compile_context>
chip_gen: v5e
topology: v5e:2x2
jax: 0.10.0
libtpu: 0.0.40
codegen_flags: <defaults>
</compile_context>

<pallas_src>
import functools

import jax
import jax.numpy as jnp
from jax.experimental import pallas as pl
from jax.experimental.pallas import tpu as pltpu

_TK = 256     # D-contraction tile (multiple of 128)
_LANE = 128   # lane width / output padding


def _round_up(x, m):
    return (x + m - 1) // m * m


def _kd_kernel(x_ref, wcat_ref, bcat_ref, wt2_ref, bt2_ref,
               t_out_ref, s_out_ref, acc_ref, *, hpad):
    k = pl.program_id(1)

    @pl.when(k == 0)
    def _():
        acc_ref[...] = jnp.zeros_like(acc_ref)

    # Fused x-contraction: one MXU matmul covers teacher layer-1 AND the
    # whole student linear (wcat = [wt1 | ws] along the output/lane axis).
    acc_ref[...] += jnp.dot(x_ref[...], wcat_ref[...],
                            preferred_element_type=jnp.float32)

    @pl.when(k == pl.num_programs(1) - 1)
    def _():
        acc = acc_ref[...] + bcat_ref[...]              # fused bias add (fp32)
        h = jnp.maximum(acc[:, :hpad], 0.0)             # teacher hidden, ReLU
        t = jnp.dot(h.astype(wt2_ref.dtype), wt2_ref[...],
                    preferred_element_type=jnp.float32) + bt2_ref[...]
        s = acc[:, hpad:]                               # student logits
        t_out_ref[...] = t.astype(t_out_ref.dtype)
        s_out_ref[...] = s.astype(s_out_ref.dtype)


def prepare_packed_params(params, tk=_TK):
    """Pack/pad weights ONCE: fused bf16 [wt1|ws], fused bias, padded wt2."""
    wt1, bt1, wt2, bt2, ws, bs = params
    d_in, hidden = wt1.shape
    n_classes = wt2.shape[1]
    hpad = _round_up(hidden, _LANE)
    cpad = _round_up(n_classes, _LANE)
    dpad = _round_up(d_in, tk)

    wt1p = jnp.zeros((dpad, hpad), jnp.float32).at[:d_in, :hidden].set(wt1)
    wsp = jnp.zeros((dpad, cpad), jnp.float32).at[:d_in, :n_classes].set(ws)
    wcat = jnp.concatenate([wt1p, wsp], axis=1).astype(jnp.bfloat16)

    bcat = jnp.zeros((1, hpad + cpad), jnp.float32)
    bcat = bcat.at[:, :hidden].set(bt1.reshape(1, hidden))
    bcat = bcat.at[:, hpad:hpad + n_classes].set(bs.reshape(1, n_classes))

    wt2p = (jnp.zeros((hpad, cpad), jnp.float32)
            .at[:hidden, :n_classes].set(wt2).astype(jnp.bfloat16))
    bt2p = jnp.zeros((1, cpad), jnp.float32).at[:, :n_classes].set(
        bt2.reshape(1, n_classes))

    return {"wcat": wcat, "bcat": bcat, "wt2": wt2p, "bt2": bt2p,
            "hpad": hpad, "cpad": cpad, "n_classes": n_classes}


def kd_forward(x_nchw, packed):
    """Returns (cumbersome_outputs, small_outputs), mirroring the torch module."""
    wcat, bcat, wt2p, bt2p = (packed["wcat"], packed["bcat"],
                              packed["wt2"], packed["bt2"])
    hpad, cpad, n_classes = packed["hpad"], packed["cpad"], packed["n_classes"]
    ncat = hpad + cpad

    batch = x_nchw.shape[0]
    x = x_nchw.reshape(batch, -1).astype(jnp.bfloat16)      # (B, D) bf16
    d_in = x.shape[1]
    dpad = _round_up(d_in, _TK)
    bpad = _round_up(max(batch, 8), 8)
    tb = min(128, bpad)
    x = jnp.pad(x, ((0, bpad - batch), (0, dpad - d_in)))
    assert wcat.shape[0] == dpad, "packed params do not match input feature dim"

    grid = (bpad // tb, dpad // _TK)
    kernel = functools.partial(_kd_kernel, hpad=hpad)

    t_pad, s_pad = pl.pallas_call(
        kernel,
        grid=grid,
        in_specs=[
            pl.BlockSpec((tb, _TK), lambda b, k: (b, k)),      # x tile
            pl.BlockSpec((_TK, ncat), lambda b, k: (k, 0)),    # fused [wt1|ws]
            pl.BlockSpec((1, ncat), lambda b, k: (0, 0)),      # fused bias
            pl.BlockSpec((hpad, cpad), lambda b, k: (0, 0)),   # teacher W2
            pl.BlockSpec((1, cpad), lambda b, k: (0, 0)),      # teacher b2
        ],
        out_specs=[
            pl.BlockSpec((tb, cpad), lambda b, k: (b, 0)),     # teacher logits
            pl.BlockSpec((tb, cpad), lambda b, k: (b, 0)),     # student logits
        ],
        out_shape=[
            jax.ShapeDtypeStruct((bpad, cpad), jnp.float32),
            jax.ShapeDtypeStruct((bpad, cpad), jnp.float32),
        ],
        scratch_shapes=[pltpu.VMEM((tb, ncat), jnp.float32)],
        compiler_params=pltpu.CompilerParams(
            dimension_semantics=("parallel", "arbitrary")),
    )(x, wcat, bcat, wt2p, bt2p)

    return t_pad[:batch, :n_classes], s_pad[:batch, :n_classes]


def init_params(key, d_in, hidden, n_classes):
    """Deterministic synthetic weights (stand-in for the dynamically imported
    cumbersome/small models of the original module)."""
    k1, k2, k3, k4, k5, k6 = jax.random.split(key, 6)
    s1 = 1.0 / jnp.sqrt(d_in)
    s2 = 1.0 / jnp.sqrt(hidden)
    wt1 = jax.random.normal(k1, (d_in, hidden), jnp.float32) * s1
    bt1 = jax.random.normal(k4, (hidden,), jnp.float32) * 0.1
    wt2 = jax.random.normal(k2, (hidden, n_classes), jnp.float32) * s2
    bt2 = jax.random.normal(k5, (n_classes,), jnp.float32) * 0.1
    ws = jax.random.normal(k3, (d_in, n_classes), jnp.float32) * s1
    bs = jax.random.normal(k6, (n_classes,), jnp.float32) * 0.1
    return wt1, bt1, wt2, bt2, ws, bs


if __name__ == "__main__":
    # Small shapes consistent with an NCHW image input.
    B, Cin, Himg, Wimg = 2, 4, 16, 16
    D = Cin * Himg * Wimg          # 1024
    HID = 64
    NCLS = 10

    key = jax.random.PRNGKey(0)
    kx, kp = jax.random.split(key)
    x = jax.random.normal(kx, (B, Cin, Himg, Wimg), jnp.float32)
    params = init_params(kp, D, HID, NCLS)
    packed = prepare_packed_params(params)

    t_out, s_out = kd_forward(x, packed)
    jax.block_until_ready((t_out, s_out))
    assert t_out.shape == (B, NCLS) and s_out.shape == (B, NCLS)

    # Reference in plain JAX using the same bf16-weight / fp32-accumulate math.
    wt1, bt1, wt2, bt2, ws, bs = params
    xf = x.reshape(B, -1).astype(jnp.bfloat16)
    wt1_b, wt2_b, ws_b = (w.astype(jnp.bfloat16) for w in (wt1, wt2, ws))
    h_ref = jnp.maximum(
        jnp.dot(xf, wt1_b, preferred_element_type=jnp.float32) + bt1, 0.0)
    t_ref = jnp.dot(h_ref.astype(jnp.bfloat16), wt2_b,
                    preferred_element_type=jnp.float32) + bt2
    s_ref = jnp.dot(xf, ws_b, preferred_element_type=jnp.float32) + bs
    assert jnp.allclose(t_out, t_ref, atol=1e-2, rtol=1e-2)
    assert jnp.allclose(s_out, s_ref, atol=1e-2, rtol=1e-2)

    # TODO(synk): loss_function is abstract in the torch module; not implemented.
    print("KERNEL_OK")
</pallas_src>

<mosaic_0001>
module attributes {stable_mosaic.version = 11 : i64} {
  func.func @_kd_kernel(%arg0: i32, %arg1: i32, %arg2: memref<8x256xbf16, #tpu.memory_space<vmem>>, %arg3: memref<256x256xbf16, #tpu.memory_space<vmem>>, %arg4: memref<1x256xf32, #tpu.memory_space<vmem>>, %arg5: memref<128x128xbf16, #tpu.memory_space<vmem>>, %arg6: memref<1x128xf32, #tpu.memory_space<vmem>>, %arg7: memref<8x128xf32, #tpu.memory_space<vmem>>, %arg8: memref<8x128xf32, #tpu.memory_space<vmem>>, %arg9: memref<8x256xf32, #tpu.memory_space<vmem>>) attributes {dimension_semantics = [#tpu.dimension_semantics<parallel>, #tpu.dimension_semantics<arbitrary>], iteration_bounds = array<i64: 1, 4>, scalar_prefetch = 0 : i64, scratch_operands = 1 : i64, tpu.core_type = #tpu.core_type<tc>, window_params = [{transform_indices = @transform_0, window_bounds = array<i64: 8, 256>}, {transform_indices = @transform_1, window_bounds = array<i64: 256, 256>}, {pipeline_mode = #tpu.pipeline_mode<synchronous>, transform_indices = @transform_2, window_bounds = array<i64: 1, 256>}, {pipeline_mode = #tpu.pipeline_mode<synchronous>, transform_indices = @transform_3, window_bounds = array<i64: 128, 128>}, {pipeline_mode = #tpu.pipeline_mode<synchronous>, transform_indices = @transform_4, window_bounds = array<i64: 1, 128>}, {transform_indices = @transform_5, window_bounds = array<i64: 8, 128>}, {transform_indices = @transform_6, window_bounds = array<i64: 8, 128>}]} {
    %c0_i32 = arith.constant 0 : i32
    %0 = arith.cmpi eq, %arg1, %c0_i32 : i32
    %1 = arith.extui %0 : i1 to i32
    %c0_i32_0 = arith.constant 0 : i32
    %2 = arith.cmpi ne, %1, %c0_i32_0 : i32
    scf.if %2 {
      %cst_9 = arith.constant 0.000000e+00 : f32
      %12 = vector.broadcast %cst_9 : f32 to vector<8x256xf32>
      %c0_10 = arith.constant 0 : index
      %c0_11 = arith.constant 0 : index
      %13 = vector.load %arg9[%c0_10, %c0_11] : memref<8x256xf32, #tpu.memory_space<vmem>>, vector<8x256xf32>
      tpu.vector_store %arg9[%c0_10, %c0_11], %12 {strides = array<i32>} : memref<8x256xf32, #tpu.memory_space<vmem>>, vector<8x256xf32>,
    } else {
    }
    %c0 = arith.constant 0 : index
    %c0_1 = arith.constant 0 : index
    %3 = vector.load %arg9[%c0, %c0_1] : memref<8x256xf32, #tpu.memory_space<vmem>>, vector<8x256xf32>
    %c0_2 = arith.constant 0 : index
    %c0_3 = arith.constant 0 : index
    %4 = vector.load %arg2[%c0_2, %c0_3] : memref<8x256xbf16, #tpu.memory_space<vmem>>, vector<8x256xbf16>
    %c0_4 = arith.constant 0 : index
    %c0_5 = arith.constant 0 : index
    %5 = vector.load %arg3[%c0_4, %c0_5] : memref<256x256xbf16, #tpu.memory_space<vmem>>, vector<256x256xbf16>
    %cst = arith.constant dense<0.000000e+00> : vector<8x256xf32>
    %6 = tpu.matmul %4, %5, %cst {dimension_numbers = #tpu.dot_dimension_numbers<[1], [0], [0], [1], [0, 0, 1, 1], [], []>} : vector<8x256xbf16>, vector<256x256xbf16>, vector<8x256xf32> -> vector<8x256xf32>
    %7 = arith.addf %3, %6 : vector<8x256xf32>
    %c0_6 = arith.constant 0 : index
    %c0_7 = arith.constant 0 : index
    %8 = vector.load %arg9[%c0_6, %c0_7] : memref<8x256xf32, #tpu.memory_space<vmem>>, vector<8x256xf32>
    tpu.vector_store %arg9[%c0_6, %c0_7], %7 {strides = array<i32>} : memref<8x256xf32, #tpu.memory_space<vmem>>, vector<8x256xf32>,
    %c3_i32 = arith.constant 3 : i32
    %9 = arith.cmpi eq, %arg1, %c3_i32 : i32
    %10 = arith.extui %9 : i1 to i32
    %c0_i32_8 = arith.constant 0 : i32
    %11 = arith.cmpi ne, %10, %c0_i32_8 : i32
    scf.if %11 {
      %c0_9 = arith.constant 0 : index
      %c0_10 = arith.constant 0 : index
      %12 = vector.load %arg9[%c0_9, %c0_10] : memref<8x256xf32, #tpu.memory_space<vmem>>, vector<8x256xf32>
      %c0_11 = arith.constant 0 : index
      %c0_12 = arith.constant 0 : index
      %13 = vector.load %arg4[%c0_11, %c0_12] : memref<1x256xf32, #tpu.memory_space<vmem>>, vector<1x256xf32>
      %14 = vector.broadcast %13 : vector<1x256xf32> to vector<8x256xf32>
      %15 = arith.addf %12, %14 : vector<8x256xf32>
      %16 = vector.extract_strided_slice %15 {offsets = [0, 0], sizes = [8, 128], strides = [1, 1]} : vector<8x256xf32> to vector<8x128xf32>
      %cst_13 = arith.constant 0.000000e+00 : f32
      %17 = vector.broadcast %cst_13 : f32 to vector<8x128xf32>
      %18 = arith.maximumf %16, %17 : vector<8x128xf32>
      %19 = arith.truncf %18 : vector<8x128xf32> to vector<8x128xbf16>
      %c0_14 = arith.constant 0 : index
      %c0_15 = arith.constant 0 : index
      %20 = vector.load %arg5[%c0_14, %c0_15] : memref<128x128xbf16, #tpu.memory_space<vmem>>, vector<128x128xbf16>
      %cst_16 = arith.constant dense<0.000000e+00> : vector<8x128xf32>
      %21 = tpu.matmul %19, %20, %cst_16 {dimension_numbers = #tpu.dot_dimension_numbers<[1], [0], [0], [1], [0, 0, 1, 1], [], []>} : vector<8x128xbf16>, vector<128x128xbf16>, vector<8x128xf32> -> vector<8x128xf32>
      %c0_17 = arith.constant 0 : index
      %c0_18 = arith.constant 0 : index
      %22 = vector.load %arg6[%c0_17, %c0_18] : memref<1x128xf32, #tpu.memory_space<vmem>>, vector<1x128xf32>
      %23 = vector.broadcast %22 : vector<1x128xf32> to vector<8x128xf32>
      %24 = arith.addf %21, %23 : vector<8x128xf32>
      %25 = vector.extract_strided_slice %15 {offsets = [0, 128], sizes = [8, 128], strides = [1, 1]} : vector<8x256xf32> to vector<8x128xf32>
      %c0_19 = arith.constant 0 : index
      %c0_20 = arith.constant 0 : index
      %26 = vector.load %arg7[%c0_19, %c0_20] : memref<8x128xf32, #tpu.memory_space<vmem>>, vector<8x128xf32>
      tpu.vector_store %arg7[%c0_19, %c0_20], %24 {strides = array<i32>} : memref<8x128xf32, #tpu.memory_space<vmem>>, vector<8x128xf32>,
      %c0_21 = arith.constant 0 : index
      %c0_22 = arith.constant 0 : index
      %27 = vector.load %arg8[%c0_21, %c0_22] : memref<8x128xf32, #tpu.memory_space<vmem>>, vector<8x128xf32>
      tpu.vector_store %arg8[%c0_21, %c0_22], %25 {strides = array<i32>} : memref<8x128xf32, #tpu.memory_space<vmem>>, vector<8x128xf32>,
    } else {
    }
    return
  }
  func.func @transform_0(%arg0: i32, %arg1: i32) -> (i32, i32) {
    %c0_i32 = arith.constant 0 : i32
    return %arg0, %arg1 : i32, i32
  }
  func.func @transform_1(%arg0: i32, %arg1: i32) -> (i32, i32) {
    %c0_i32 = arith.constant 0 : i32
    %c0_i32_0 = arith.constant 0 : i32
    return %arg1, %c0_i32 : i32, i32
  }
  func.func @transform_2(%arg0: i32, %arg1: i32) -> (i32, i32) {
    %c0_i32 = arith.constant 0 : i32
    %c0_i32_0 = arith.constant 0 : i32
    %c0_i32_1 = arith.constant 0 : i32
    return %c0_i32, %c0_i32_0 : i32, i32
  }
  func.func @transform_3(%arg0: i32, %arg1: i32) -> (i32, i32) {
    %c0_i32 = arith.constant 0 : i32
    %c0_i32_0 = arith.constant 0 : i32
    %c0_i32_1 = arith.constant 0 : i32
    return %c0_i32, %c0_i32_0 : i32, i32
  }
  func.func @transform_4(%arg0: i32, %arg1: i32) -> (i32, i32) {
    %c0_i32 = arith.constant 0 : i32
    %c0_i32_0 = arith.constant 0 : i32
    %c0_i32_1 = arith.constant 0 : i32
    return %c0_i32, %c0_i32_0 : i32, i32
  }
  func.func @transform_5(%arg0: i32, %arg1: i32) -> (i32, i32) {
    %c0_i32 = arith.constant 0 : i32
    %c0_i32_0 = arith.constant 0 : i32
    return %arg0, %c0_i32 : i32, i32
  }
  func.func @transform_6(%arg0: i32, %arg1: i32) -> (i32, i32) {
    %c0_i32 = arith.constant 0 : i32
    %c0_i32_0 = arith.constant 0 : i32
    return %arg0, %c0_i32 : i32, i32
  }
}

</mosaic_0001>

<bundles_post_ra>
// kernel: tpu_custom_call.1
= control target key start
LH: loop header
LB: loop body
LE: loop exit
PB: predicated region body
PF: predicated region fallthrough
CT: control target
= control target key end

     0   :  { %s1713_s0 = inlined_call_operand.hbm [shape: bf16[8,1024], index: 0, kind: input, shape index: {}]   ;;  %s1714_s1 = inlined_call_operand.hbm [shape: bf16[1024,256], index: 1, kind: input, shape index: {}]   ;;  %s1715_s2 = inlined_call_operand.hbm [shape: f32[1,256], index: 2, kind: input, shape index: {}]   ;;  %s1716_s3 = inlined_call_operand.hbm [shape: bf16[128,128], index: 3, kind: input, shape index: {}]   ;;  %s1717_s4 = inlined_call_operand.vmem [shape: f32[1,128], index: 4, kind: input, shape index: {}]   ;;  %s1718_s5 = inlined_call_operand.hbm [shape: f32[8,128], index: 5, kind: output, shape index: {0}]   ;;  %s1719_s6 = inlined_call_operand.hbm [shape: f32[8,128], index: 6, kind: output, shape index: {1}]  }
   0x1   :  { %1720 = sst [smem:[#allocation20_spill]] %s1713_s0 }
   0x2   :  { %1721 = sst [smem:[#allocation21_spill]] %s1715_s2 }
   0x3   :  { %1722 = sst [smem:[#allocation22_spill]] %s1716_s3 }
   0x4   :  { %12 = vsyncpa [#allocation4], 0 }
   0x5   :  { %14 = vsyncpa [#allocation4 + $0x1], 0 }
   0x6   :  { %15 = vsyncpa [#allocation7], 0 }
   0x7   :  { %17 = vsyncpa [#allocation7 + $0x1], 0 }
   0x8   :  { %18 = vsyncpa [#allocation10], 0 }
   0x9   :  { %19 = vsyncpa [#allocation5], 0 }
   0xa   :  { %20 = vsyncpa [#allocation13], 0  ;;  %s1488_s21 = smov 0   ;;  %s1490_s22 = smov 0  }
   0xb   :  { %s1492_s23 = smov 0   ;;  %s1494_s24 = smov 0  }
   0xc   :  { %s1496_s25 = smov 0   ;;  %s1498_s26 = smov 0  }
   0xd LB: > { %s1517_s27 = sadd.s32 4294967295, %s1442_s26   ;;  %p60_p0 = scmp.ne.s32.totalorder %s1426_s22, %s1422_s21  ;;  %s1442_s26 = sphi %s1498_s26, %s26_s26   ;;  %s1438_s25 = sphi %s1496_s25, %s1734_s25   ;;  %s1434_s24 = sphi %s1494_s24, %s1733_s24   ;;  %s1430_s23 = sphi %s1492_s23, %s1732_s23   ;;  %s1426_s22 = sphi %s1490_s22, %s1731_s22   ;;  %s1422_s21 = sphi %s1488_s21, %s1730_s21  }
   0xe   : > { %p61_p1 = scmp.eq.s32.totalorder %s1517_s27, 0  ;;  %p868_p2 = scmp.ge.s32.totalorder %s1442_s26, 1 }
   0xf   : > { %p212_p3 = scmp.lt.s32.totalorder %s1442_s26, 5  ;;  %s1724_s2 = sld [smem:[#allocation21_spill]] }
  0x10   : > { %p1525_p4 = por %p61_p1, %p60_p0  ;;  %s1444_s9 = smov [#allocation8]  }
  0x11   : > { %p1532_p5 = pnand %p868_p2, %p212_p3  ;;  %s226_s10 = sshll.u32 %s1444_s9, 4  ;;  %s227_s10 = int_to_ptr.vmem [resolvable:$true] %s226_s10 }
  0x12   : > { %s1726_s3 = sld [smem:[#allocation22_spill]]  ;;  %s1445_s14 = smov [#allocation9]  }
  0x13   : > { %p1115_p6 = pneg %p1532_p5  ;;  %s237_s15 = sshll.u32 %s1445_s14, 4  ;;  %s238_s15 = int_to_ptr.vmem [resolvable:$true] %s237_s15 }
  0x14   : > { %s1446_s16 = smov 64   ;;  %s1447_s17 = smov 4  }
  0x15   : > { %s224_s7 = sshll.u32 %s1724_s2, 4  ;;  %p1116_p7 = pnand %p1115_p6, %p61_p1  ;;  %s225_s7 = int_to_ptr.hbm [resolvable:$true] %s224_s7 }
  0x16   : > { %s35_s18 = sadd.s32 1, %s1438_s25  ;;  %s47_s19 = sadd.s32 1, %s1430_s23 }
  0x17   : > { %1118 = dma.hbm_to_vmem [thread:$0]  (!%p1116_p7), %s225_s7, 32, %s227_s10, [#allocation7]  }
  0x18   : > { %s235_s13 = sshll.u32 %s1726_s3, 4  ;;  %p36_p8 = scmp.ge.s32.totalorder %s35_s18, 4  ;;  %s236_s13 = int_to_ptr.hbm [resolvable:$true] %s235_s13 }
  0x19   : > { %1121 = dma.hbm_to_vmem [thread:$0]  (!%p1116_p7), %s236_s13, 1024, %s238_s15, [#allocation10], %s1446_s16, %s1446_s16, %s1447_s17  }
  0x1a   : > { %p54_p9 = scmp.ne.s32.totalorder %s1430_s23, %s1426_s22  ;;  %p55_p10 = scmp.eq.s32.totalorder %s1442_s26, 0 }
  0x1b   : > { %p1131_p11 = scmp.lt.s32.totalorder %s1442_s26, 4  ;;  %s1736_s18 = smov (%p36_p8, %s35_s18), 0 }
  0x1c   : > { %p1551_p12 = por %p55_p10, %p54_p9  ;;  %s254_s21 = sand.u32 1, %s1430_s23  }
  0x1d   : > { %s43_s29 = ssub.s32 %s1438_s25, %s1736_s18  ;;  %s872_s30 = sshll.u32 %s254_s21, 3 }
  0x1e   : > { %p45_p13 = scmp.eq.s32.totalorder %s43_s29, 0  ;;  %s1052_s7 = sshll.u32 %s1438_s25, 3 }
  0x1f   : > { %s1728_s0 = sld [smem:[#allocation20_spill]]  ;;  %s258_s13 = scalar_lea.vmem [#allocation3], %s872_s30 }
  0x20   : > { %s1560_s9 = scalar_select %p45_p13, %s1430_s23, %s47_s19  }
  0x21   : > { %s269_s14 = sshll.u32 %s258_s13, 4  ;;  %p1569_p0 = pnand %p1131_p11, %p1551_p12  ;;  %s270_s14 = int_to_ptr.vmem [resolvable:$true] %s269_s14 }
  0x22   : > { %s875_s17 = sshll.u32 %s254_s21, 8  ;;  %s1054_s19 = sshll.u32 %s1438_s25, 8 }
  0x23   : > { %s255_s29 = scalar_lea.sflag [#allocation4], %s254_s21  ;;  %s280_s10 = scalar_lea.vmem [#allocation6], %s875_s17 }
  0x24   : > { %s276_s30 = sand.u32 1, %s1442_s26   ;;  %s286_s20 = scalar_lea.hbm %s1714_s1, %s1054_s19 }
  0x25   : > { %s265_s12 = scalar_lea.hbm %s1728_s0, %s1052_s7  ;;  %s289_s7 = sshll.u32 %s280_s10, 4  ;;  %s290_s7 = int_to_ptr.vmem [resolvable:$true] %s289_s7 }
  0x26   : > { %s267_s15 = sshll.u32 %s265_s12, 4  ;;  %s287_s13 = sshll.u32 %s286_s20, 4  ;;  %s268_s15 = int_to_ptr.hbm [resolvable:$true] %s267_s15  ;;  %s288_s13 = int_to_ptr.hbm [resolvable:$true] %s287_s13 }
  0x27   : > { %1125 = dma.hbm_to_vmem [thread:$0]  (!%p1569_p0), %s268_s15, 128, %s270_s14, %s255_s29  }
  0x28   : > { %s277_s0 = scalar_lea.sflag [#allocation7], %s276_s30  ;;  %s1448_s2 = smov 128  }
  0x29   : > { %s1449_s3 = smov 8   ;;  %301 = sbr.rel (%p1532_p5) target bundleno = 416 (0x1a0), region = 40 }
  0x2a   : > { %1128 = dma.hbm_to_vmem [thread:$0]  (!%p1569_p0), %s288_s13, 4096, %s290_s7, %s277_s0, %s1448_s2, %s1448_s2, %s1449_s3  }
  0x2b   : > { %s303_s21 = sand.u32 (!%p1532_p5), 1, %s1426_s22  }
  0x2c   : > { %s880_s14 = sshll.u32 (!%p1532_p5), %s303_s21, 3  ;;  %s304_s15 = scalar_lea.sflag (!%p1532_p5), [#allocation4], %s303_s21 }
  0x2d   : > { %s1585_s17 = scalar_lea.vmem (!%p1532_p5), [#allocation3], %s880_s14 }
  0x2e   : > { %1397 = dma.done.wait (%p1525_p4), %s304_s15, 128  }
  0x2f   : > { %1399 = vsyncadd (%p1525_p4), %s304_s15, 4294967168  ;;  %s313_s19 = sand.u32 1, %s1517_s27   ;;  %s881_s16 = sshll.u32 %s303_s21, 8 }
  0x30   : > { %s314_s0 = scalar_lea.sflag [#allocation7], %s313_s19  ;;  %s1592_s2 = scalar_lea.vmem [#allocation6], %s881_s16 }
  0x31   : > { %1401 = dma.done.wait (%p1525_p4), %s314_s0, 4096  }
  0x32   : > { %1403 = vsyncadd (%p1525_p4), %s314_s0, 4294963200 }
  0x33   : > { %1405 = dma.done.wait (%p61_p1), [#allocation7], 32  }
  0x34   : > { %1407 = vsyncadd (%p61_p1), [#allocation7], 4294967264 }
  0x35   : > { %1409 = dma.done.wait (%p61_p1), [#allocation10], 1024  }
  0x36   : > { %1411 = vsyncadd (%p61_p1), [#allocation10], 4294966272  ;;  %p884_p2 = scmp.ne.s32.totalorder %s1434_s24, 0 }
  0x38   : > { %362 = sbr.rel (%p884_p2) target bundleno = 64 (0x40), region = 60 }
  0x3d   : > { %v1450_v0 = vmov 0.0  }
  0x3e   : > { %363 = vst [vmem:[#allocation2] sm:$0xff] %v1450_v0 }
  0x3f   : > { %364 = vst [vmem:[#allocation2 + $0x8] sm:$0xff] %v1450_v0 }
  0x40 PF: > { %v943_v1 = vld [vmem:[%s1592_s2 + $0x70] sm:$0xf]  ;;  %v1070_v2 = vld [vmem:[%s1592_s2 + $0x74] sm:$0xf0]  ;;  %v1069_v6 = vld [vmem:[%s1592_s2 + $0x74] sm:$0xf] }
  0x41   : > { %v1007_v3 = vld [vmem:[%s1592_s2 + $0xf0] sm:$0xf]  ;;  %v944_v4 = vor.u32 %v1070_v2, %v943_v1  ;;  %v1086_v5 = vld [vmem:[%s1592_s2 + $0xf4] sm:$0xf0]  ;;  %v945_v7 = vld [vmem:[%s1592_s2 + $0x78] sm:$0xf0] }
  0x42   : > { %v1008_v8 = vor.u32 %v1086_v5, %v1007_v3  ;;  %v948_v9 = vor.u32 %v1069_v6, %v945_v7  ;;  %v1085_v10 = vld [vmem:[%s1592_s2 + $0xf4] sm:$0xf]  ;;  %v1009_v11 = vld [vmem:[%s1592_s2 + $0xf8] sm:$0xf0]  ;;  %v935_v12 = vld [vmem:[%s1592_s2 + $0x60] sm:$0xf] }
  0x43   : > { %567 = vmatpush.bf16.msra.mxu0 %v944_v4  ;;  %v1012_v13 = vor.u32 %v1085_v10, %v1009_v11  ;;  %v1068_v14 = vld [vmem:[%s1592_s2 + $0x64] sm:$0xf0]  ;;  %v999_v15 = vld [vmem:[%s1592_s2 + $0xe0] sm:$0xf]  ;;  %v1067_v19 = vld [vmem:[%s1592_s2 + $0x64] sm:$0xf] }
  0x44   : > { %v1084_v16 = vld [vmem:[%s1592_s2 + $0xe4] sm:$0xf0]  ;;  %580 = vmatpush.bf16.msra.mxu1 %v1008_v8  ;;  %593 = vmatpush.bf16.msra.mxu2 %v948_v9  ;;  %v936_v17 = vor.u32 %v1068_v14, %v935_v12  ;;  %v937_v20 = vld [vmem:[%s1592_s2 + $0x68] sm:$0xf0]  ;;  %v1083_v21 = vld [vmem:[%s1592_s2 + $0xe4] sm:$0xf] }
  0x45   : > { %v1000_v18 = vor.u32 %v1084_v16, %v999_v15  ;;  %606 = vmatpush.bf16.msra.mxu3 %v1012_v13  ;;  %v940_v22 = vor.u32 %v1067_v19, %v937_v20  ;;  %v1001_v23 = vld [vmem:[%s1592_s2 + $0xe8] sm:$0xf0]  ;;  %v927_v24 = vld [vmem:[%s1592_s2 + $0x50] sm:$0xf]  ;;  %v1066_v25 = vld [vmem:[%s1592_s2 + $0x54] sm:$0xf0] }
  0x46   : > { %v1004_v26 = vor.u32 %v1083_v21, %v1001_v23  ;;  %v991_v27 = vld [vmem:[%s1592_s2 + $0xd0] sm:$0xf]  ;;  %v1082_v28 = vld [vmem:[%s1592_s2 + $0xd4] sm:$0xf0]  ;;  %v1065_v29 = vld [vmem:[%s1592_s2 + $0x54] sm:$0xf]  ;;  %v928_v30 = vor.u32 %v1066_v25, %v927_v24 }
  0x47   : > { %568 = vmatpush.bf16.msra.mxu0 %v936_v17  ;;  %v929_v31 = vld [vmem:[%s1592_s2 + $0x58] sm:$0xf0]  ;;  %v1081_v32 = vld [vmem:[%s1592_s2 + $0xd4] sm:$0xf]  ;;  %v992_v34 = vor.u32 %v1082_v28, %v991_v27  ;;  %v919_v36 = vld [vmem:[%s1592_s2 + $0x40] sm:$0xf] }
  0x48   : > { %v993_v33 = vld [vmem:[%s1592_s2 + $0xd8] sm:$0xf0]  ;;  %581 = vmatpush.bf16.msra.mxu1 %v1000_v18  ;;  %594 = vmatpush.bf16.msra.mxu2 %v940_v22  ;;  %v932_v35 = vor.u32 %v1065_v29, %v929_v31  ;;  %v1064_v37 = vld [vmem:[%s1592_s2 + $0x44] sm:$0xf0]  ;;  %v983_v38 = vld [vmem:[%s1592_s2 + $0xc0] sm:$0xf] }
  0x49   : > { %607 = vmatpush.bf16.msra.mxu3 %v1004_v26  ;;  %v996_v39 = vor.u32 %v1081_v32, %v993_v33  ;;  %v1080_v40 = vld [vmem:[%s1592_s2 + $0xc4] sm:$0xf0]  ;;  %v1063_v41 = vld [vmem:[%s1592_s2 + $0x44] sm:$0xf]  ;;  %v921_v42 = vld [vmem:[%s1592_s2 + $0x48] sm:$0xf0]  ;;  %v920_v45 = vor.u32 %v1064_v37, %v919_v36 }
  0x4a   : > { %v1079_v43 = vld [vmem:[%s1592_s2 + $0xc4] sm:$0xf]  ;;  %v985_v44 = vld [vmem:[%s1592_s2 + $0xc8] sm:$0xf0]  ;;  %v984_v46 = vor.u32 %v1080_v40, %v983_v38  ;;  %v924_v47 = vor.u32 %v1063_v41, %v921_v42  ;;  %v911_v48 = vld [vmem:[%s1592_s2 + $0x30] sm:$0xf] }
  0x4b   : > { %569 = vmatpush.bf16.msra.mxu0 %v928_v30  ;;  %v1062_v49 = vld [vmem:[%s1592_s2 + $0x34] sm:$0xf0]  ;;  %v975_v50 = vld [vmem:[%s1592_s2 + $0xb0] sm:$0xf]  ;;  %v988_v51 = vor.u32 %v1079_v43, %v985_v44  ;;  %v1061_v53 = vld [vmem:[%s1592_s2 + $0x34] sm:$0xf] }
  0x4c   : > { %582 = vmatpush.bf16.msra.mxu1 %v992_v34  ;;  %595 = vmatpush.bf16.msra.mxu2 %v932_v35  ;;  %v1078_v52 = vld [vmem:[%s1592_s2 + $0xb4] sm:$0xf0]  ;;  %v913_v54 = vld [vmem:[%s1592_s2 + $0x38] sm:$0xf0]  ;;  %v1077_v55 = vld [vmem:[%s1592_s2 + $0xb4] sm:$0xf]  ;;  %v912_v57 = vor.u32 %v1062_v49, %v911_v48 }
  0x4d   : > { %608 = vmatpush.bf16.msra.mxu3 %v996_v39  ;;  %v977_v56 = vld [vmem:[%s1592_s2 + $0xb8] sm:$0xf0]  ;;  %v976_v58 = vor.u32 %v1078_v52, %v975_v50  ;;  %v916_v59 = vor.u32 %v1061_v53, %v913_v54  ;;  %v903_v60 = vld [vmem:[%s1592_s2 + $0x20] sm:$0xf]  ;;  %v1060_v61 = vld [vmem:[%s1592_s2 + $0x24] sm:$0xf0] }
  0x4e   : > { %v967_v62 = vld [vmem:[%s1592_s2 + $0xa0] sm:$0xf]  ;;  %v980_v63 = vor.u32 %v1077_v55, %v977_v56  ;;  %v1076_v0 = vld [vmem:[%s1592_s2 + $0xa4] sm:$0xf0]  ;;  %v1059_v1 = vld [vmem:[%s1592_s2 + $0x24] sm:$0xf]  ;;  %v904_v5 = vor.u32 %v1060_v61, %v903_v60 }
  0x4f   : > { %570 = vmatpush.bf16.msra.mxu0 %v920_v45  ;;  %v905_v2 = vld [vmem:[%s1592_s2 + $0x28] sm:$0xf0]  ;;  %v1075_v3 = vld [vmem:[%s1592_s2 + $0xa4] sm:$0xf]  ;;  %v968_v6 = vor.u32 %v1076_v0, %v967_v62  ;;  %v895_v8 = vld [vmem:[%s1592_s2 + $0x10] sm:$0xf] }
  0x50   : > { %583 = vmatpush.bf16.msra.mxu1 %v984_v46  ;;  %596 = vmatpush.bf16.msra.mxu2 %v924_v47  ;;  %v969_v4 = vld [vmem:[%s1592_s2 + $0xa8] sm:$0xf0]  ;;  %v908_v7 = vor.u32 %v1059_v1, %v905_v2  ;;  %v1058_v9 = vld [vmem:[%s1592_s2 + $0x14] sm:$0xf0]  ;;  %v959_v10 = vld [vmem:[%s1592_s2 + $0x90] sm:$0xf] }
  0x51   : > { %609 = vmatpush.bf16.msra.mxu3 %v988_v51  ;;  %v972_v11 = vor.u32 %v1075_v3, %v969_v4  ;;  %v1074_v12 = vld [vmem:[%s1592_s2 + $0x94] sm:$0xf0]  ;;  %v1057_v13 = vld [vmem:[%s1592_s2 + $0x14] sm:$0xf]  ;;  %v897_v14 = vld [vmem:[%s1592_s2 + $0x18] sm:$0xf0]  ;;  %v896_v17 = vor.u32 %v1058_v9, %v895_v8 }
  0x52   : > { %v1073_v15 = vld [vmem:[%s1592_s2 + $0x94] sm:$0xf]  ;;  %v961_v16 = vld [vmem:[%s1592_s2 + $0x98] sm:$0xf0]  ;;  %v960_v19 = vor.u32 %v1074_v12, %v959_v10  ;;  %v900_v20 = vor.u32 %v1057_v13, %v897_v14  ;;  %v887_v21 = vld [vmem:[%s1592_s2] sm:$0xf] }
  0x53   : > { %571 = vmatpush.bf16.msra.mxu0 %v912_v57  ;;  %v367_v18 = vld [vmem:[%s1585_s17] sm:$0xff]  ;;  %v1056_v22 = vld [vmem:[%s1592_s2 + $0x4] sm:$0xf0]  ;;  %v951_v23 = vld [vmem:[%s1592_s2 + $0x80] sm:$0xf]  ;;  %v964_v24 = vor.u32 %v1073_v15, %v961_v16  ;;  %p1013_p1 = scmp.ne.s32.totalorder %s1434_s24, 3 }
  0x54   : > { %584 = vmatpush.bf16.msra.mxu1 %v976_v58  ;;  %597 = vmatpush.bf16.msra.mxu2 %v916_v59  ;;  %v1072_v25 = vld [vmem:[%s1592_s2 + $0x84] sm:$0xf0]  ;;  %v1055_v26 = vld [vmem:[%s1592_s2 + $0x4] sm:$0xf]  ;;  %v889_v27 = vld [vmem:[%s1592_s2 + $0x8] sm:$0xf0]  ;;  %v401_v30 = vunpack.c.l.b16 %v367_v18  ;;  %v888_v31 = vor.u32 %v1056_v22, %v887_v21  ;;  %v402_v32 = vunpack.c.h.b16 %v367_v18 }
  0x55   : > { %610 = vmatpush.bf16.msra.mxu3 %v980_v63  ;;  %v1071_v28 = vld [vmem:[%s1592_s2 + $0x84] sm:$0xf]  ;;  %v953_v29 = vld [vmem:[%s1592_s2 + $0x88] sm:$0xf0]  ;;  %v952_v33 = vor.u32 %v1072_v25, %v951_v23  ;;  %v892_v34 = vor.u32 %v1055_v26, %v889_v27 }
  0x56   : > { %v956_v35 = vor.u32 %v1071_v28, %v953_v29  ;;  %v403_v36 = vpack.c.b16 %v401_v30, %v401_v30  ;;  %v404_v37 = vpack.c.b16 %v402_v32, %v402_v32  ;;  %v365_v39 = vld [vmem:[#allocation2] sm:$0xff]  ;;  %v366_v44 = vld [vmem:[#allocation2 + $0x8] sm:$0xff] }
  0x57   : > { %572 = vmatpush.bf16.msra.mxu0 %v904_v5 }
  0x58   : > { %585 = vmatpush.bf16.msra.mxu1 %v968_v6  ;;  %598 = vmatpush.bf16.msra.mxu2 %v908_v7 }
  0x59   : > { %611 = vmatpush.bf16.msra.mxu3 %v972_v11 }
  0x5b   : > { %573 = vmatpush.bf16.msra.mxu0 %v896_v17 }
  0x5c   : > { %586 = vmatpush.bf16.msra.mxu1 %v960_v19  ;;  %599 = vmatpush.bf16.msra.mxu2 %v900_v20 }
  0x5d   : > { %612 = vmatpush.bf16.msra.mxu3 %v964_v24 }
  0x5f   : > { %574 = vmatpush.bf16.msra.mxu0 %v888_v31 }
  0x60   : > { %587 = vmatpush.bf16.msra.mxu1 %v952_v33  ;;  %600 = vmatpush.bf16.msra.mxu2 %v892_v34 }
  0x61   : > { %613 = vmatpush.bf16.msra.mxu3 %v956_v35 }
  0x62   : > { %575 = vmatmul.bf16.vlgmr.msra.gmra.mxu0 %v403_v36 }
  0x63   : > { %588 = vmatmul.bf16.vlgmr.msra.gmra.mxu1 %v404_v37  ;;  %601 = vmatmul.bf16.vlgmr.msra.gmra.mxu2 %v403_v36 }
  0x64   : > { %614 = vmatmul.bf16.vlgmr.msra.gmra.mxu3 %v404_v37 }
  0xdf   : > { %v576_v38 = vpop.f32.mrf.mxu0 }
  0xe0   : > { %v589_v40 = vpop.f32.mrf.mxu1 }
  0xe1   : > { %v590_v41 = vadd.f32 %v589_v40, %v576_v38 }
  0xe3   : > { %v619_v42 = vadd.f32 %v590_v41, %v365_v39 }
  0xe5   : > { %621 = vst [vmem:[#allocation2] sm:$0xff] %v619_v42 }
  0xe6   : > { %v602_v43 = vpop.f32.mrf.mxu2 }
  0xe7   : > { %v615_v45 = vpop.f32.mrf.mxu3  ;;  %v578_v46 = vpop.f32.mrf.mxu0 }
  0xe8   : > { %v616_v47 = vadd.f32 %v615_v45, %v602_v43  ;;  %v591_v48 = vpop.f32.mrf.mxu1 }
  0xea   : > { %v620_v49 = vadd.f32 %v616_v47, %v366_v44 }
  0xeb   : > { %626 = sbr.rel (%p1013_p1) target bundleno = 406 (0x196), region = 64 }
  0xec   : > { %622 = vst [vmem:[#allocation2 + $0x8] sm:$0xff] %v620_v49 }
  0xee   : > { %v604_v50 = vpop.f32.mrf.mxu2 }
  0xef   : > { %v617_v51 = vpop.f32.mrf.mxu3 }
  0xf0   : > { %v1094_v52 = vld [vmem:[#allocation9 + $0x38] sm:$0xff]  ;;  %v1093_v53 = vld [vmem:[#allocation9 + $0x30] sm:$0xff]  ;;  %v1092_v57 = vld [vmem:[#allocation9 + $0x28] sm:$0xff] }
  0xf1   : > { %707 = vmatpush.bf16.msra.mxu0 %v1094_v52  ;;  %v629_v55 = vld [vmem:[#allocation8] sm:$0x3]  ;;  %v1091_v59 = vld [vmem:[#allocation9 + $0x20] sm:$0xff]  ;;  %v1089_v62 = vld [vmem:[#allocation9 + $0x10] sm:$0xff] }
  0xf2   : > { %v632_v56 = vperm.slane %v629_v55, 1  ;;  %v1090_v60 = vld [vmem:[#allocation9 + $0x18] sm:$0xff]  ;;  %v631_v61 = vperm.slane %v629_v55, 0  ;;  %v1088_v1 = vld [vmem:[#allocation9 + $0x8] sm:$0xff]  ;;  %v1087_v3 = vld [vmem:[#allocation9] sm:$0xff] }
  0xf3   : > { %v628_v54 = vld [vmem:[#allocation2 + $0x8] sm:$0xff]  ;;  %v627_v63 = vld [vmem:[#allocation2] sm:$0xff] }
  0xf4   : > { %v636_v58 = vadd.f32 %v632_v56, %v628_v54  ;;  %v635_v0 = vadd.f32 %v631_v61, %v627_v63  ;;  %v1195_v5 = vld [vmem:[%s1717_s4] ss:$0 sm:$0xff] }
  0xf5   : > { %708 = vmatpush.bf16.msra.mxu0 %v1093_v53 }
  0xf6   : > { %721 = vst [vmem:[#allocation12] sm:$0xff] %v636_v58  ;;  %v637_v2 = vmax.f32 %v635_v0, 0.0 }
  0xf8   : > { %v638_v4 = vpack.c.bf16 %v637_v2, %v637_v2 }
  0xf9   : > { %709 = vmatpush.bf16.msra.mxu0 %v1092_v57 }
  0xfd   : > { %710 = vmatpush.bf16.msra.mxu0 %v1091_v59 }
 0x101   : > { %711 = vmatpush.bf16.msra.mxu0 %v1090_v60 }
 0x105   : > { %712 = vmatpush.bf16.msra.mxu0 %v1089_v62 }
 0x109   : > { %713 = vmatpush.bf16.msra.mxu0 %v1088_v1 }
 0x10d   : > { %714 = vmatpush.bf16.msra.mxu0 %v1087_v3 }
 0x110   : > { %715 = vmatmul.bf16.vlgmr.msra.gmra.mxu0 %v638_v4 }
 0x18d   : > { %v716_v6 = vpop.f32.mrf.mxu0 }
 0x18e   : > { %v717_v7 = vadd.f32 %v1195_v5, %v716_v6 }
 0x190   : > { %720 = vst [vmem:[#allocation11] sm:$0xff] %v717_v7 }
 0x195   : > { %v718_v8 = vpop.f32.mrf.mxu0 }
 0x196 PF: > { %p1134_p3 = scmp.eq.s32.totalorder %s1517_s27, 3  ;;  %s732_s29 = sshll.u32 %s1718_s5, 4  ;;  %s733_s29 = int_to_ptr.hbm [resolvable:$true] %s732_s29 }
 0x197   : > { %s1451_s10 = smov [#allocation11]   ;;  %s1452_s30 = smov [#allocation12]  }
 0x198   : > { %s730_s7 = sshll.u32 %s1451_s10, 4  ;;  %s744_s11 = sshll.u32 %s1452_s30, 4  ;;  %s731_s7 = int_to_ptr.vmem [resolvable:$true] %s730_s7  ;;  %s745_s11 = int_to_ptr.vmem [resolvable:$true] %s744_s11 }
 0x199   : > { %1108 = dma.vmem_to_hbm [thread:$0]  (%p1134_p3), %s731_s7, 128, %s733_s29, [#allocation5]  }
 0x19a   : > { %s746_s13 = sshll.u32 %s1719_s6, 4  ;;  %s747_s13 = int_to_ptr.hbm [resolvable:$true] %s746_s13 }
 0x19b   : > { %1110 = dma.vmem_to_hbm [thread:$0]  (%p1134_p3), %s745_s11, 128, %s747_s13, [#allocation13]  }
 0x19c   : > { %1413 = dma.done.wait (%p1134_p3), [#allocation5], 128  }
 0x19d   : > { %1415 = vsyncadd (%p1134_p3), [#allocation5], 4294967168 }
 0x19e   : > { %1417 = dma.done.wait (%p1134_p3), [#allocation13], 128  }
 0x19f   : > { %1419 = vsyncadd (%p1134_p3), [#allocation13], 4294967168 }
 0x1a0 PF: > { %s26_s26 = sadd.s32 1, %s1442_s26   ;;  %s1730_s21 = smov %s1426_s22 }
 0x1a1   : > { %p23_p4 = scmp.ge.s32.totalorder %s26_s26, 6   ;;  %s1731_s22 = smov %s1430_s23 }
 0x1a2   : > { %s1732_s23 = smov %s1560_s9  ;;  %s1733_s24 = smov %s1438_s25 }
 0x1a3   : > { %s1734_s25 = smov %s1736_s18  ;;  %25 = sbr.rel (!%p23_p4) target bundleno = 13 (0xd), region = 116 }
 0x1a8   :  { %765 = vsyncpa [#allocation4], 1 }
 0x1a9   :  { %767 = vsyncpa [#allocation4 + $0x1], 1 }
 0x1aa   :  { %768 = vsyncpa [#allocation7], 1 }
 0x1ab   :  { %770 = vsyncpa [#allocation7 + $0x1], 1 }
 0x1ac   :  { %771 = vsyncpa [#allocation10], 1 }
 0x1ad   :  { %772 = vsyncpa [#allocation5], 1 }
 0x1ae   :  { %774 = vsyncpa [#allocation5 + $0x1], 1 }
 0x1af   :  { %775 = vsyncpa [#allocation13], 1 }

</bundles_post_ra>
